<compile_context>
chip_gen: v6e
topology: v6e:2x2x1
jax: 0.10.0
libtpu: 0.0.40
codegen_flags: <defaults>
</compile_context>

<pallas_src>
import functools
import math

import jax
import jax.numpy as jnp
from jax.experimental import pallas as pl
from jax.experimental.pallas import tpu as pltpu


def _round_up(x, m):
    return ((x + m - 1) // m) * m


def _pick_chunk(total, target):
    """Largest multiple-of-128 divisor of `total` that is <= target (total % 128 == 0)."""
    best, c = 128, 128
    while c <= min(total, target):
        if total % c == 0:
            best = c
        c += 128
    return best


# ---------------------------------------------------------------------------
# Kernel 1 (projection-first path only): H = X_scaled @ W, stored as bf16.
# ---------------------------------------------------------------------------
def _project_kernel(x_ref, w_ref, h_ref):
    h_ref[...] = jnp.dot(x_ref[...], w_ref[...],
                         preferred_element_type=jnp.float32).astype(jnp.bfloat16)


def _project(feat_p, w_p, *, tile_rows):
    n_pad, fin_pad = feat_p.shape
    fout_pad = w_p.shape[1]
    tile_f = _pick_chunk(fout_pad, 512)

    vmem = (2 * tile_rows * fin_pad * 2      # X tiles (bf16, double-buffered)
            + 2 * fin_pad * tile_f * 2       # W tiles
            + 2 * tile_rows * tile_f * 2)    # output tiles
    vmem_limit = min(int(vmem * 2) + (8 << 20), 128 << 20)

    return pl.pallas_call(
        _project_kernel,
        out_shape=jax.ShapeDtypeStruct((n_pad, fout_pad), jnp.bfloat16),
        grid_spec=pltpu.PrefetchScalarGridSpec(
            num_scalar_prefetch=0,
            grid=(n_pad // tile_rows, fout_pad // tile_f),
            in_specs=[
                pl.BlockSpec((tile_rows, fin_pad), lambda i, j: (i, 0)),
                pl.BlockSpec((fin_pad, tile_f), lambda i, j: (0, j)),
            ],
            out_specs=pl.BlockSpec((tile_rows, tile_f), lambda i, j: (i, j)),
        ),
        compiler_params=pltpu.CompilerParams(
            dimension_semantics=("parallel", "parallel"),
            vmem_limit_bytes=vmem_limit),
    )(feat_p, w_p)


# ---------------------------------------------------------------------------
# Kernel 2: tiled neighborhood aggregation with a K-reduction accumulator.
#   acc[i, :] += A[i, k] @ X_scaled[k, :]       (MXU, bf16 in / f32 acc)
#   deg[i]    += row-sum(A[i, k])               (only when right norm needed)
# last-k epilogue: (optional @W), right norm, + bias, exact-erf GELU, dtype cast.
# ---------------------------------------------------------------------------
def _aggregate_kernel(adj_ref, x_ref, *rest, apply_w, right_mode, need_deg):
    idx = 0
    if apply_w:
        w_ref = rest[idx]; idx += 1
    bias_ref = rest[idx]; idx += 1
    o_ref = rest[idx]; idx += 1
    acc_ref = rest[idx]; idx += 1
    deg_ref = rest[idx] if need_deg else None

    k = pl.program_id(1)

    @pl.when(k == 0)
    def _init():
        acc_ref[...] = jnp.zeros_like(acc_ref)
        if need_deg:
            deg_ref[...] = jnp.zeros_like(deg_ref)

    adj = adj_ref[...]                                          # (ti, tk) bf16
    acc_ref[...] += jnp.dot(adj, x_ref[...], preferred_element_type=jnp.float32)
    if need_deg:
        deg_ref[...] += jnp.sum(adj.astype(jnp.float32), axis=1, keepdims=True)

    @pl.when(k == pl.num_programs(1) - 1)
    def _finalize():
        r = acc_ref[...]
        if apply_w:
            r = jnp.dot(r.astype(jnp.bfloat16), w_ref[...],
                        preferred_element_type=jnp.float32)
        if need_deg:
            d = jnp.maximum(deg_ref[...], 1.0)          # clamp(min=1) like the reference
            if right_mode == "both":
                r = r * jax.lax.rsqrt(d)
            else:                                       # "right"
                r = r * pl.reciprocal(d, approx=True)
        r = r + bias_ref[...]
        inv_sqrt2 = jnp.float32(0.7071067811865476)
        o_ref[...] = (0.5 * r * (1.0 + jax.lax.erf(r * inv_sqrt2))).astype(o_ref.dtype)


def _aggregate(adj_p, x_p, w_p, bias_p, *, tile_dst, tile_src,
               apply_w, right_mode, out_dtype):
    n_pad = adj_p.shape[0]
    feat_dim = x_p.shape[1]
    fout_pad = bias_p.shape[1]
    need_deg = right_mode in ("both", "right")

    in_specs = [
        pl.BlockSpec((tile_dst, tile_src), lambda i, k: (i, k)),   # adjacency
        pl.BlockSpec((tile_src, feat_dim), lambda i, k: (k, 0)),   # pre-scaled X (or H)
    ]
    args = [adj_p, x_p]
    if apply_w:
        in_specs.append(pl.BlockSpec((feat_dim, fout_pad), lambda i, k: (0, 0)))
        args.append(w_p)
    in_specs.append(pl.BlockSpec((1, fout_pad), lambda i, k: (0, 0)))      # bias
    args.append(bias_p)

    scratch = [pltpu.VMEM((tile_dst, feat_dim), jnp.float32)]
    if need_deg:
        scratch.append(pltpu.VMEM((tile_dst, 1), jnp.float32))

    out_bytes = jnp.dtype(out_dtype).itemsize
    # Scoped-VMEM budget derived from the actual blocks (2x double buffering on
    # every BlockSpec input/output) plus headroom for internal scratch / layout pad.
    vmem = (2 * tile_dst * tile_src * 2                          # adjacency (bf16)
            + 2 * tile_src * feat_dim * 2                        # X / H tiles (bf16)
            + (2 * feat_dim * fout_pad * 2 if apply_w else 0)    # resident W
            + 2 * 8 * fout_pad * 4                               # bias (sublane padded)
            + 2 * tile_dst * fout_pad * out_bytes                # output block
            + tile_dst * feat_dim * 4                            # f32 accumulator
            + (tile_dst * 128 * 4 if need_deg else 0))           # deg (lane padded)
    vmem_limit = min(int(vmem * 2) + (8 << 20), 128 << 20)

    kernel = functools.partial(_aggregate_kernel, apply_w=apply_w,
                               right_mode=right_mode, need_deg=need_deg)
    return pl.pallas_call(
        kernel,
        out_shape=jax.ShapeDtypeStruct((n_pad, fout_pad), out_dtype),
        grid_spec=pltpu.PrefetchScalarGridSpec(
            num_scalar_prefetch=0,
            grid=(n_pad // tile_dst, n_pad // tile_src),
            in_specs=in_specs,
            out_specs=pl.BlockSpec((tile_dst, fout_pad), lambda i, k: (i, 0)),
            scratch_shapes=scratch,
        ),
        compiler_params=pltpu.CompilerParams(
            dimension_semantics=("parallel", "arbitrary"),
            vmem_limit_bytes=vmem_limit),
    )(*args)


# ---------------------------------------------------------------------------
# Public wrapper
# ---------------------------------------------------------------------------
def reconv_forward(adj, feat, type_info, weight, bias, weight_type,
                   norm="both", tile_dst=512, tile_src=512,
                   out_dtype=jnp.float32):
    """adj: dense (N, N) adjacency with adj[dst, src] != 0 iff edge src->dst (0/1).
    feat: (N, in_feats). Returns gelu-activated (N, out_feats) in `out_dtype`."""
    if norm not in ("none", "both", "right", "left"):
        raise ValueError(f'Invalid norm value "{norm}".')
    N, fin = feat.shape
    fout = weight.shape[1]

    fin_pad = _round_up(fin, 128)     # keep 128-lane padding (mem-bound; don't chase 256 MXU)
    fout_pad = _round_up(fout, 128)

    # --- tile selection -----------------------------------------------------
    # Multiples of 128, capped at the padded node count; if the whole dst axis
    # fit in one tile but there is enough work, split it in two so v7x's two
    # TensorCores each get a share (near-zero impact on v5e/v6e).
    n_min = _round_up(N, 128)
    tile_src = max(128, min(_round_up(tile_src, 128), n_min))
    tile_dst = max(128, min(_round_up(tile_dst, 128), n_min))
    n_pad = _round_up(N, math.lcm(tile_dst, tile_src))
    if n_pad >= 256 and n_pad // tile_dst < 2:
        tile_dst = n_pad // 2          # multiple of 64 -> sublane-aligned

    # --- per-source scale (left norm folded with the type scale) -------------
    wt = weight_type.astype(jnp.float32)[type_info]
    if norm in ("left", "both"):
        # Single pass over adj in its native dtype with f32 accumulation --
        # no full-N^2 f32 copy is materialized.
        out_degs = jnp.maximum(jnp.sum(adj, axis=0, dtype=jnp.float32), 1.0)
        left = jax.lax.rsqrt(out_degs) if norm == "both" else 1.0 / out_degs
        src_scale = left * wt
    else:
        src_scale = wt

    # --- operand preparation (fused cast + pad, with fast paths) -------------
    if N == n_pad and adj.dtype == jnp.bfloat16:
        adj_p = adj
    else:
        adj_p = jnp.zeros((n_pad, n_pad), jnp.bfloat16).at[:N, :N].set(
            adj.astype(jnp.bfloat16))

    # Pre-scale X ONCE (O(N*fin)) so the aggregate hot loop has no per-tile
    # upcast / multiply / downcast.
    feat_scaled = (feat.astype(jnp.float32) * src_scale[:, None]).astype(jnp.bfloat16)
    if N == n_pad and fin == fin_pad:
        feat_p = feat_scaled
    else:
        feat_p = jnp.zeros((n_pad, fin_pad), jnp.bfloat16).at[:N, :fin].set(feat_scaled)

    w_p = jnp.zeros((fin_pad, fout_pad), jnp.bfloat16).at[:fin, :fout].set(
        weight.astype(jnp.bfloat16))
    bias_p = jnp.zeros((1, fout_pad), jnp.float32).at[0, :fout].set(
        bias.astype(jnp.float32))

    # --- path choice ----------------------------------------------------------
    # FLOP-aware: aggregation-first makes the O(N^2) matmul run over fin lanes,
    # projection-first over fout lanes. Aggregation-first keeps W resident
    # (double-buffered bf16) in the epilogue, so when that would strain v7x's
    # 64 MiB VMEM we force projection-first instead.
    w_resident_bytes = 2 * fin_pad * fout_pad * 2
    aggregation_first = (fin_pad <= fout_pad) and (w_resident_bytes <= 24 << 20)

    if aggregation_first:
        out_p = _aggregate(adj_p, feat_p, w_p, bias_p,
                           tile_dst=tile_dst, tile_src=tile_src,
                           apply_w=True, right_mode=norm, out_dtype=out_dtype)
    else:
        h_p = _project(feat_p, w_p, tile_rows=tile_dst)
        out_p = _aggregate(adj_p, h_p, None, bias_p,
                           tile_dst=tile_dst, tile_src=tile_src,
                           apply_w=False, right_mode=norm, out_dtype=out_dtype)
    return out_p[:N, :fout]


# ---------------------------------------------------------------------------
# pure-JAX reference (mirrors the PyTorch module) for a sanity check
# ---------------------------------------------------------------------------
def _reference(adj, feat, type_info, weight, bias, weight_type, norm="both"):
    adj = adj.astype(jnp.float32)
    h = feat.astype(jnp.float32)
    if norm in ("left", "both"):
        degs = jnp.maximum(jnp.sum(adj, axis=0), 1.0)
        nrm = degs ** -0.5 if norm == "both" else 1.0 / degs
        h = h * nrm[:, None]
    h = h @ weight.astype(jnp.float32)
    h = h * weight_type[type_info][:, None]
    rst = adj @ h
    if norm in ("right", "both"):
        degs = jnp.maximum(jnp.sum(adj, axis=1), 1.0)
        nrm = degs ** -0.5 if norm == "both" else 1.0 / degs
        rst = rst * nrm[:, None]
    rst = rst + bias
    return jax.nn.gelu(rst, approximate=False)


if __name__ == "__main__":
    key = jax.random.PRNGKey(0)
    N, fin, fout, num_type = 8, 32, 32, 4
    k_feat, k_adj, k_type, k_w = jax.random.split(key, 4)

    feat = jax.random.normal(k_feat, (N, fin), jnp.float32)
    adj = (jax.random.uniform(k_adj, (N, N)) < 0.4).astype(jnp.float32)
    type_info = jax.random.randint(k_type, (N,), 0, num_type)

    # Parameter init mirroring REConv (weight: xavier_uniform, bias: zeros);
    # weight_type made non-trivial to actually exercise the type scaling.
    bound = math.sqrt(6.0 / (fin + fout))
    weight = jax.random.uniform(k_w, (fin, fout), jnp.float32, -bound, bound)
    bias = jnp.zeros((fout,), jnp.float32)
    weight_type = 1.0 + 0.25 * jnp.arange(num_type, dtype=jnp.float32)

    # Path A: aggregation-first (fin <= fout), norm='both'.
    out = reconv_forward(adj, feat, type_info, weight, bias, weight_type, norm="both")
    jax.block_until_ready(out)
    assert out.shape == (N, fout) and out.dtype == jnp.float32
    ref = _reference(adj, feat, type_info, weight, bias, weight_type, "both")
    err = float(jnp.max(jnp.abs(out - ref)))
    assert err < 0.1, f"aggregation-first/both mismatch: {err}"

    # norm='right' (approx-reciprocal epilogue) and norm='none' (no deg scratch).
    for nrm in ("right", "none"):
        o = reconv_forward(adj, feat, type_info, weight, bias, weight_type, norm=nrm)
        jax.block_until_ready(o)
        r = _reference(adj, feat, type_info, weight, bias, weight_type, nrm)
        e = float(jnp.max(jnp.abs(o - r)))
        assert e < 0.1, f"norm={nrm} mismatch: {e}"

    # Path B: projection-first (fout < fin), norm='both'.
    fin2, fout2 = 160, 32
    k_f2, k_w2 = jax.random.split(k_feat)
    feat2 = jax.random.normal(k_f2, (N, fin2), jnp.float32)
    bound2 = math.sqrt(6.0 / (fin2 + fout2))
    weight2 = jax.random.uniform(k_w2, (fin2, fout2), jnp.float32, -bound2, bound2)
    bias2 = jnp.zeros((fout2,), jnp.float32)
    out2 = reconv_forward(adj, feat2, type_info, weight2, bias2, weight_type, norm="both")
    jax.block_until_ready(out2)
    assert out2.shape == (N, fout2) and out2.dtype == jnp.float32
    ref2 = _reference(adj, feat2, type_info, weight2, bias2, weight_type, "both")
    err2 = float(jnp.max(jnp.abs(out2 - ref2)))
    assert err2 < 0.1, f"projection-first path mismatch: {err2}"

    print("KERNEL_OK")
</pallas_src>

<mosaic_0001>
module attributes {stable_mosaic.version = 11 : i64} {
  func.func @_aggregate_kernel(%arg0: i32, %arg1: i32, %arg2: memref<128x128xbf16, #tpu.memory_space<vmem>>, %arg3: memref<128x128xbf16, #tpu.memory_space<vmem>>, %arg4: memref<128x128xbf16, #tpu.memory_space<vmem>>, %arg5: memref<1x128xf32, #tpu.memory_space<vmem>>, %arg6: memref<128x128xf32, #tpu.memory_space<vmem>>, %arg7: memref<128x128xf32, #tpu.memory_space<vmem>>, %arg8: memref<128x1xf32, #tpu.memory_space<vmem>>) attributes {dimension_semantics = [#tpu.dimension_semantics<parallel>, #tpu.dimension_semantics<arbitrary>], iteration_bounds = array<i64: 1, 1>, scalar_prefetch = 0 : i64, scratch_operands = 2 : i64, tpu.core_type = #tpu.core_type<tc>, window_params = [{transform_indices = @transform_0, window_bounds = array<i64: 128, 128>}, {transform_indices = @transform_1, window_bounds = array<i64: 128, 128>}, {pipeline_mode = #tpu.pipeline_mode<synchronous>, transform_indices = @transform_2, window_bounds = array<i64: 128, 128>}, {pipeline_mode = #tpu.pipeline_mode<synchronous>, transform_indices = @transform_3, window_bounds = array<i64: 1, 128>}, {transform_indices = @transform_4, window_bounds = array<i64: 128, 128>}]} {
    %c0_i32 = arith.constant 0 : i32
    %0 = arith.cmpi eq, %arg1, %c0_i32 : i32
    %1 = arith.extui %0 : i1 to i32
    %c0_i32_0 = arith.constant 0 : i32
    %2 = arith.cmpi ne, %1, %c0_i32_0 : i32
    scf.if %2 {
      %cst_15 = arith.constant 0.000000e+00 : f32
      %18 = vector.broadcast %cst_15 : f32 to vector<128x128xf32>
      %c0_16 = arith.constant 0 : index
      %c0_17 = arith.constant 0 : index
      %19 = vector.load %arg7[%c0_16, %c0_17] : memref<128x128xf32, #tpu.memory_space<vmem>>, vector<128x128xf32>
      tpu.vector_store %arg7[%c0_16, %c0_17], %18 {strides = array<i32>} : memref<128x128xf32, #tpu.memory_space<vmem>>, vector<128x128xf32>,
      %cst_18 = arith.constant 0.000000e+00 : f32
      %20 = vector.broadcast %cst_18 : f32 to vector<128x1xf32>
      %c0_19 = arith.constant 0 : index
      %c0_20 = arith.constant 0 : index
      %21 = vector.load %arg8[%c0_19, %c0_20] : memref<128x1xf32, #tpu.memory_space<vmem>>, vector<128x1xf32>
      tpu.vector_store %arg8[%c0_19, %c0_20], %20 {strides = array<i32>} : memref<128x1xf32, #tpu.memory_space<vmem>>, vector<128x1xf32>,
    } else {
    }
    %c0 = arith.constant 0 : index
    %c0_1 = arith.constant 0 : index
    %3 = vector.load %arg2[%c0, %c0_1] : memref<128x128xbf16, #tpu.memory_space<vmem>>, vector<128x128xbf16>
    %c0_2 = arith.constant 0 : index
    %c0_3 = arith.constant 0 : index
    %4 = vector.load %arg7[%c0_2, %c0_3] : memref<128x128xf32, #tpu.memory_space<vmem>>, vector<128x128xf32>
    %c0_4 = arith.constant 0 : index
    %c0_5 = arith.constant 0 : index
    %5 = vector.load %arg3[%c0_4, %c0_5] : memref<128x128xbf16, #tpu.memory_space<vmem>>, vector<128x128xbf16>
    %cst = arith.constant dense<0.000000e+00> : vector<128x128xf32>
    %6 = tpu.matmul %3, %5, %cst {dimension_numbers = #tpu.dot_dimension_numbers<[1], [0], [0], [1], [0, 0, 1, 1], [], []>} : vector<128x128xbf16>, vector<128x128xbf16>, vector<128x128xf32> -> vector<128x128xf32>
    %7 = arith.addf %4, %6 : vector<128x128xf32>
    %c0_6 = arith.constant 0 : index
    %c0_7 = arith.constant 0 : index
    %8 = vector.load %arg7[%c0_6, %c0_7] : memref<128x128xf32, #tpu.memory_space<vmem>>, vector<128x128xf32>
    tpu.vector_store %arg7[%c0_6, %c0_7], %7 {strides = array<i32>} : memref<128x128xf32, #tpu.memory_space<vmem>>, vector<128x128xf32>,
    %c0_8 = arith.constant 0 : index
    %c0_9 = arith.constant 0 : index
    %9 = vector.load %arg8[%c0_8, %c0_9] : memref<128x1xf32, #tpu.memory_space<vmem>>, vector<128x1xf32>
    %10 = arith.extf %3 : vector<128x128xbf16> to vector<128x128xf32>
    %cst_10 = arith.constant dense<0.000000e+00> : vector<128xf32>
    %11 = vector.multi_reduction <add>, %10, %cst_10 [1] : vector<128x128xf32> to vector<128xf32>
    %12 = vector.shape_cast %11 : vector<128xf32> to vector<128x1xf32>
    %13 = arith.addf %9, %12 : vector<128x1xf32>
    %c0_11 = arith.constant 0 : index
    %c0_12 = arith.constant 0 : index
    %14 = vector.load %arg8[%c0_11, %c0_12] : memref<128x1xf32, #tpu.memory_space<vmem>>, vector<128x1xf32>
    tpu.vector_store %arg8[%c0_11, %c0_12], %13 {strides = array<i32>} : memref<128x1xf32, #tpu.memory_space<vmem>>, vector<128x1xf32>,
    %c0_i32_13 = arith.constant 0 : i32
    %15 = arith.cmpi eq, %arg1, %c0_i32_13 : i32
    %16 = arith.extui %15 : i1 to i32
    %c0_i32_14 = arith.constant 0 : i32
    %17 = arith.cmpi ne, %16, %c0_i32_14 : i32
    scf.if %17 {
      %c0_15 = arith.constant 0 : index
      %c0_16 = arith.constant 0 : index
      %18 = vector.load %arg7[%c0_15, %c0_16] : memref<128x128xf32, #tpu.memory_space<vmem>>, vector<128x128xf32>
      %19 = arith.truncf %18 : vector<128x128xf32> to vector<128x128xbf16>
      %c0_17 = arith.constant 0 : index
      %c0_18 = arith.constant 0 : index
      %20 = vector.load %arg4[%c0_17, %c0_18] : memref<128x128xbf16, #tpu.memory_space<vmem>>, vector<128x128xbf16>
      %cst_19 = arith.constant dense<0.000000e+00> : vector<128x128xf32>
      %21 = tpu.matmul %19, %20, %cst_19 {dimension_numbers = #tpu.dot_dimension_numbers<[1], [0], [0], [1], [0, 0, 1, 1], [], []>} : vector<128x128xbf16>, vector<128x128xbf16>, vector<128x128xf32> -> vector<128x128xf32>
      %c0_20 = arith.constant 0 : index
      %c0_21 = arith.constant 0 : index
      %22 = vector.load %arg8[%c0_20, %c0_21] : memref<128x1xf32, #tpu.memory_space<vmem>>, vector<128x1xf32>
      %cst_22 = arith.constant 1.000000e+00 : f32
      %23 = vector.broadcast %cst_22 : f32 to vector<128x1xf32>
      %24 = arith.maximumf %22, %23 : vector<128x1xf32>
      %25 = math.rsqrt %24 : vector<128x1xf32>
      %26 = vector.broadcast %25 : vector<128x1xf32> to vector<128x128xf32>
      %27 = arith.mulf %21, %26 : vector<128x128xf32>
      %c0_23 = arith.constant 0 : index
      %c0_24 = arith.constant 0 : index
      %28 = vector.load %arg5[%c0_23, %c0_24] : memref<1x128xf32, #tpu.memory_space<vmem>>, vector<1x128xf32>
      %29 = vector.broadcast %28 : vector<1x128xf32> to vector<128x128xf32>
      %30 = arith.addf %27, %29 : vector<128x128xf32>
      %cst_25 = arith.constant 5.000000e-01 : f32
      %31 = vector.broadcast %cst_25 : f32 to vector<128x128xf32>
      %32 = arith.mulf %31, %30 : vector<128x128xf32>
      %cst_26 = arith.constant 0.707106769 : f32
      %33 = vector.broadcast %cst_26 : f32 to vector<128x128xf32>
      %34 = arith.mulf %30, %33 : vector<128x128xf32>
      %35 = math.erf %34 : vector<128x128xf32>
      %cst_27 = arith.constant 1.000000e+00 : f32
      %36 = vector.broadcast %cst_27 : f32 to vector<128x128xf32>
      %37 = arith.addf %36, %35 : vector<128x128xf32>
      %38 = arith.mulf %32, %37 : vector<128x128xf32>
      %c0_28 = arith.constant 0 : index
      %c0_29 = arith.constant 0 : index
      %39 = vector.load %arg6[%c0_28, %c0_29] : memref<128x128xf32, #tpu.memory_space<vmem>>, vector<128x128xf32>
      tpu.vector_store %arg6[%c0_28, %c0_29], %38 {strides = array<i32>} : memref<128x128xf32, #tpu.memory_space<vmem>>, vector<128x128xf32>,
    } else {
    }
    return
  }
  func.func @transform_0(%arg0: i32, %arg1: i32) -> (i32, i32) {
    %c0_i32 = arith.constant 0 : i32
    return %arg0, %arg1 : i32, i32
  }
  func.func @transform_1(%arg0: i32, %arg1: i32) -> (i32, i32) {
    %c0_i32 = arith.constant 0 : i32
    %c0_i32_0 = arith.constant 0 : i32
    return %arg1, %c0_i32 : i32, i32
  }
  func.func @transform_2(%arg0: i32, %arg1: i32) -> (i32, i32) {
    %c0_i32 = arith.constant 0 : i32
    %c0_i32_0 = arith.constant 0 : i32
    %c0_i32_1 = arith.constant 0 : i32
    return %c0_i32, %c0_i32_0 : i32, i32
  }
  func.func @transform_3(%arg0: i32, %arg1: i32) -> (i32, i32) {
    %c0_i32 = arith.constant 0 : i32
    %c0_i32_0 = arith.constant 0 : i32
    %c0_i32_1 = arith.constant 0 : i32
    return %c0_i32, %c0_i32_0 : i32, i32
  }
  func.func @transform_4(%arg0: i32, %arg1: i32) -> (i32, i32) {
    %c0_i32 = arith.constant 0 : i32
    %c0_i32_0 = arith.constant 0 : i32
    return %arg0, %c0_i32 : i32, i32
  }
}

</mosaic_0001>

<bundles_post_ra>
// kernel: tpu_custom_call.1
= control target key start
LH: loop header
LB: loop body
LE: loop exit
PB: predicated region body
PF: predicated region fallthrough
CT: control target
= control target key end

     0   :  { %9 = vsyncpa [#allocation5], 0  ;;  %s1391_s0 = inlined_call_operand.hbm [shape: bf16[128,128], index: 0, kind: input, shape index: {}]   ;;  %s1392_s1 = inlined_call_operand.hbm [shape: bf16[128,128], index: 1, kind: input, shape index: {}]   ;;  %s1393_s2 = inlined_call_operand.hbm [shape: bf16[128,128], index: 2, kind: input, shape index: {}]   ;;  %s1394_s3 = inlined_call_operand.vmem [shape: f32[1,128], index: 3, kind: input, shape index: {}]   ;;  %s1395_s4 = inlined_call_operand.hbm [shape: f32[128,128], index: 4, kind: output, shape index: {}]  }
   0x1   :  { %10 = vsyncpa [#allocation8], 0 }
   0x2   :  { %11 = vsyncpa [#allocation6], 0  ;;  %s1251_s15 = smov [#allocation7]   ;;  %s1252_s17 = smov [#allocation4]  }
   0x3   :  { %s29_s16 = sshll.u32 %s1251_s15, 4  ;;  %s17_s18 = sshll.u32 %s1252_s17, 4  ;;  %s30_s16 = int_to_ptr.vmem [resolvable:$true] %s29_s16  ;;  %s18_s18 = int_to_ptr.vmem [resolvable:$true] %s17_s18 }
   0x4   :  { %s1173_s19 = scalar_lea.vmem %s30_s16, 1024  ;;  %p1178_p1 = scmp.lt.s32.totalorder %s30_s16, %s30_s16 }
   0x5   :  { %p1174_p0 = scmp.ne.s32.totalorder %s30_s16, %s1173_s19  ;;  %p1179_p2 = scmp.lt.s32.totalorder %s1173_s19, %s1173_s19 }
   0x7   :  { %p1180_p3 = por %p1179_p2, %p1178_p1 }
   0x9   :  { %p1181_p4 = pnand %p1180_p3, %p1174_p0 }
   0xb   :  { %1184 = shalt.err (!%p1181_p4)
}
   0xc   :  { %s1253_s20 = smov 64   ;;  %s1254_s21 = smov 4  }
   0xd   :  { %35 = dma.hbm_to_vmem [thread:$0]  %s1392_s1, 1024, %s30_s16, [#allocation8], %s1253_s20, %s1253_s20, %s1254_s21  }
   0xe   :  { %s1193_s24 = scalar_lea.vmem %s18_s18, 1024  ;;  %p1198_p6 = scmp.lt.s32.totalorder %s18_s18, %s18_s18 }
   0xf   :  { %p1194_p5 = scmp.ne.s32.totalorder %s18_s18, %s1193_s24  ;;  %p1199_p7 = scmp.lt.s32.totalorder %s1193_s24, %s1193_s24 }
  0x11   :  { %p1200_p8 = por %p1199_p7, %p1198_p6 }
  0x13   :  { %p1201_p9 = pnand %p1200_p8, %p1194_p5 }
  0x15   :  { %1204 = shalt.err (!%p1201_p9)
}
  0x16   :  { %23 = dma.hbm_to_vmem [thread:$0]  %s1391_s0, 1024, %s18_s18, [#allocation5], %s1253_s20, %s1253_s20, %s1254_s21  }
  0x17   :  { %s1255_s27 = smov [#allocation9]  }
  0x18   :  { %s41_s28 = sshll.u32 %s1255_s27, 4  ;;  %s42_s28 = int_to_ptr.vmem [resolvable:$true] %s41_s28 }
  0x19   :  { %s1213_s29 = scalar_lea.vmem %s42_s28, 1024  ;;  %p1218_p11 = scmp.lt.s32.totalorder %s42_s28, %s42_s28 }
  0x1a   :  { %p1214_p10 = scmp.ne.s32.totalorder %s42_s28, %s1213_s29  ;;  %p1219_p12 = scmp.lt.s32.totalorder %s1213_s29, %s1213_s29 }
  0x1c   :  { %p1220_p13 = por %p1219_p12, %p1218_p11 }
  0x1e   :  { %p1221_p0 = pnand %p1220_p13, %p1214_p10 }
  0x20   :  { %1224 = shalt.err (!%p1221_p0)
}
  0x21   :  { %47 = dma.hbm_to_vmem [thread:$0]  %s1393_s2, 1024, %s42_s28, [#allocation8], %s1253_s20, %s1253_s20, %s1254_s21  }
  0x22   :  { %1245 = dma.done.wait [#allocation5], 1024  }
  0x23   :  { %1246 = vsyncadd [#allocation5], 4294966272 }
  0x24   :  { %1247 = dma.done.wait [#allocation8], 2048  }
  0x25   :  { %1248 = vsyncadd [#allocation8], 4294965248  ;;  %vm80_vm0 = vcmask 7168   ;;  %v1256_v0 = vmov 0.0   ;;  %v1069_v1 = vld [vmem:[#allocation7 + $0x38] sm:$0xff]   ;;  %v1070_v2 = vld [vmem:[#allocation7 + $0x30] sm:$0xff]  }
  0x26   :  { %81 = vst.msk [vmem:[#allocation3] sm:$0xff] %vm80_vm0, %v1256_v0  ;;  %82 = vst.msk [vmem:[#allocation3 + $0x8] sm:$0xff] %vm80_vm0, %v1256_v0  ;;  %993 = vmatprep.subr.bf16.mxu0 %v1069_v1  ;;  %v1071_v3 = vld [vmem:[#allocation7 + $0x28] sm:$0xff]   ;;  %v1072_v4 = vld [vmem:[#allocation7 + $0x20] sm:$0xff]   ;;  %v1257_v41 = vmov 0  }
  0x27   :  { %83 = vst.msk [vmem:[#allocation3 + $0x10] sm:$0xff] %vm80_vm0, %v1256_v0  ;;  %84 = vst.msk [vmem:[#allocation3 + $0x18] sm:$0xff] %vm80_vm0, %v1256_v0  ;;  %994 = vmatpush3.bf16.msra.mxu0 %v1069_v1  ;;  %v97_v5 = vld [vmem:[#allocation4] sm:$0xff]   ;;  %v1073_v7 = vld [vmem:[#allocation7 + $0x18] sm:$0xff]   ;;  %1068 = vset.pattern.permute.xlu1 %v1257_v41 }
  0x28   :  { %85 = vst.msk [vmem:[#allocation3 + $0x20] sm:$0xff] %vm80_vm0, %v1256_v0  ;;  %86 = vst.msk [vmem:[#allocation3 + $0x28] sm:$0xff] %vm80_vm0, %v1256_v0  ;;  %995 = vmatprep.subr.bf16.mxu0 %v1070_v2  ;;  %v386_v6 = vunpack.c.l.bf16 %v97_v5  ;;  %v99_v8 = vld [vmem:[#allocation4 + $0x8] sm:$0xff]   ;;  %1009 = vmatprep.mubr.bf16.mxu0 %v97_v5  ;;  %v1085_v10 = vld [vmem:[#allocation9 + $0x38] sm:$0xff]   ;;  %v387_v11 = vunpack.c.h.bf16 %v97_v5 }
  0x29   :  { %87 = vst.msk [vmem:[#allocation3 + $0x30] sm:$0xff] %vm80_vm0, %v1256_v0  ;;  %88 = vst.msk [vmem:[#allocation3 + $0x38] sm:$0xff] %vm80_vm0, %v1256_v0  ;;  %v388_v9 = vunpack.c.l.bf16 %v99_v8  ;;  %v1086_v12 = vld [vmem:[#allocation9 + $0x30] sm:$0xff]   ;;  %v389_v13 = vunpack.c.h.bf16 %v99_v8  ;;  %1025 = vmatprep.subr.bf16.mxu1 %v1085_v10  ;;  %v1087_v15 = vld [vmem:[#allocation9 + $0x28] sm:$0xff]   ;;  %1067 = vset.pattern.permute.xlu0 %v1257_v41 }
  0x2a   :  { %89 = vst.msk [vmem:[#allocation3 + $0x40] sm:$0xff] %vm80_vm0, %v1256_v0  ;;  %90 = vst.msk [vmem:[#allocation3 + $0x48] sm:$0xff] %vm80_vm0, %v1256_v0  ;;  %402 = vadd.xlane.f32.xlu0 %v386_v6  ;;  %v101_v14 = vld [vmem:[#allocation4 + $0x10] sm:$0xff]   ;;  %1026 = vmatpush3.bf16.msra.mxu1 %v1085_v10  ;;  %v103_v19 = vld [vmem:[#allocation4 + $0x18] sm:$0xff]  }
  0x2b   :  { %91 = vst.msk [vmem:[#allocation3 + $0x50] sm:$0xff] %vm80_vm0, %v1256_v0  ;;  %92 = vst.msk [vmem:[#allocation3 + $0x58] sm:$0xff] %vm80_vm0, %v1256_v0  ;;  %996 = vmatpush3.bf16.msra.mxu0 %v1070_v2  ;;  %406 = vadd.xlane.f32.xlu1 %v388_v9  ;;  %v1074_v16 = vld [vmem:[#allocation7 + $0x10] sm:$0xff]   ;;  %v390_v17 = vunpack.c.l.bf16 %v101_v14  ;;  %v391_v18 = vunpack.c.h.bf16 %v101_v14  ;;  %v1088_v20 = vld [vmem:[#allocation9 + $0x20] sm:$0xff]   ;;  %v392_v22 = vunpack.c.l.bf16 %v103_v19  ;;  %v393_v23 = vunpack.c.h.bf16 %v103_v19 }
  0x2c   :  { %93 = vst.msk [vmem:[#allocation3 + $0x60] sm:$0xff] %vm80_vm0, %v1256_v0  ;;  %94 = vst.msk [vmem:[#allocation3 + $0x68] sm:$0xff] %vm80_vm0, %v1256_v0  ;;  %997 = vmatprep.subr.bf16.mxu0 %v1071_v3  ;;  %1027 = vmatprep.subr.bf16.mxu1 %v1086_v12  ;;  %v1075_v21 = vld [vmem:[#allocation7 + $0x8] sm:$0xff]   ;;  %v105_v24 = vld [vmem:[#allocation4 + $0x20] sm:$0xff]  }
  0x2d   :  { %95 = vst.msk [vmem:[#allocation3 + $0x70] sm:$0xff] %vm80_vm0, %v1256_v0  ;;  %96 = vst.msk [vmem:[#allocation3 + $0x78] sm:$0xff] %vm80_vm0, %v1256_v0  ;;  %v1089_v25 = vld [vmem:[#allocation9 + $0x18] sm:$0xff]   ;;  %v1076_v26 = vld [vmem:[#allocation7] sm:$0xff]   ;;  %v394_v27 = vunpack.c.l.bf16 %v105_v24  ;;  %v395_v28 = vunpack.c.h.bf16 %v105_v24 }
  0x2e   :  { %404 = vadd.xlane.f32.xlu0 %v387_v11  ;;  %1028 = vmatpush3.bf16.msra.mxu1 %v1086_v12  ;;  %v107_v29 = vld [vmem:[#allocation4 + $0x28] sm:$0xff]   ;;  %v1090_v30 = vld [vmem:[#allocation9 + $0x10] sm:$0xff]   ;;  %v111_v36 = vld [vmem:[#allocation4 + $0x38] sm:$0xff]  }
  0x2f   :  { %998 = vmatpush3.bf16.msra.mxu0 %v1071_v3  ;;  %408 = vadd.xlane.f32.xlu1 %v389_v13  ;;  %v396_v31 = vunpack.c.l.bf16 %v107_v29  ;;  %v397_v32 = vunpack.c.h.bf16 %v107_v29  ;;  %v109_v33 = vld [vmem:[#allocation4 + $0x30] sm:$0xff]   ;;  %v400_v37 = vunpack.c.l.bf16 %v111_v36  ;;  %v401_v38 = vunpack.c.h.bf16 %v111_v36  ;;  %v1091_v39 = vld [vmem:[#allocation9 + $0x8] sm:$0xff]   ;;  %v1092_v40 = vld [vmem:[#allocation9] sm:$0xff]  }
  0x30   :  { %999 = vmatprep.subr.bf16.mxu0 %v1072_v4  ;;  %1029 = vmatprep.subr.bf16.mxu1 %v1087_v15  ;;  %v398_v34 = vunpack.c.l.bf16 %v109_v33  ;;  %v399_v35 = vunpack.c.h.bf16 %v109_v33  ;;  %v370_v42 = vld [vmem:[#allocation3] sm:$0xff]  ;;  %v372_v43 = vld [vmem:[#allocation3 + $0x10] sm:$0xff]  ;;  %v371_v47 = vld [vmem:[#allocation3 + $0x8] sm:$0xff] }
  0x31   :  { %v373_v49 = vld [vmem:[#allocation3 + $0x18] sm:$0xff]  ;;  %v374_v54 = vld [vmem:[#allocation3 + $0x20] sm:$0xff]  ;;  %v375_v55 = vld [vmem:[#allocation3 + $0x28] sm:$0xff] }
  0x32   :  { %410 = vadd.xlane.f32.xlu0 %v390_v17  ;;  %1030 = vmatpush3.bf16.msra.mxu1 %v1087_v15  ;;  %v376_v60 = vld [vmem:[#allocation3 + $0x30] sm:$0xff]  ;;  %v377_v62 = vld [vmem:[#allocation3 + $0x38] sm:$0xff]  ;;  %v378_v6 = vld [vmem:[#allocation3 + $0x40] sm:$0xff] }
  0x33   :  { %1000 = vmatpush3.bf16.msra.mxu0 %v1072_v4  ;;  %412 = vadd.xlane.f32.xlu1 %v391_v18  ;;  %v379_v9 = vld [vmem:[#allocation3 + $0x48] sm:$0xff]  ;;  %v381_v17 = vld [vmem:[#allocation3 + $0x58] sm:$0xff] }
  0x34   :  { %1001 = vmatprep.subr.bf16.mxu0 %v1073_v7  ;;  %1031 = vmatprep.subr.bf16.mxu1 %v1088_v20 }
  0x36   :  { %414 = vadd.xlane.f32.xlu0 %v392_v22  ;;  %1032 = vmatpush3.bf16.msra.mxu1 %v1088_v20  ;;  %v382_v22 = vld [vmem:[#allocation3 + $0x60] sm:$0xff] }
  0x37   :  { %1002 = vmatpush3.bf16.msra.mxu0 %v1073_v7  ;;  %416 = vadd.xlane.f32.xlu1 %v393_v23 }
  0x38   :  { %1003 = vmatprep.subr.bf16.mxu0 %v1074_v16  ;;  %1033 = vmatprep.subr.bf16.mxu1 %v1089_v25 }
  0x3a   :  { %418 = vadd.xlane.f32.xlu0 %v394_v27  ;;  %1034 = vmatpush3.bf16.msra.mxu1 %v1089_v25  ;;  %v383_v25 = vld [vmem:[#allocation3 + $0x68] sm:$0xff] }
  0x3b   :  { %1004 = vmatpush3.bf16.msra.mxu0 %v1074_v16  ;;  %420 = vadd.xlane.f32.xlu1 %v395_v28 }
  0x3c   :  { %1005 = vmatprep.subr.bf16.mxu0 %v1075_v21  ;;  %1035 = vmatprep.subr.bf16.mxu1 %v1090_v30 }
  0x3e   :  { %422 = vadd.xlane.f32.xlu0 %v396_v31  ;;  %1036 = vmatpush3.bf16.msra.mxu1 %v1090_v30  ;;  %v384_v31 = vld [vmem:[#allocation3 + $0x70] sm:$0xff] }
  0x3f   :  { %1006 = vmatpush3.bf16.msra.mxu0 %v1075_v21  ;;  %424 = vadd.xlane.f32.xlu1 %v397_v32 }
  0x40   :  { %1007 = vmatprep.subr.bf16.mxu0 %v1076_v26  ;;  %1037 = vmatprep.subr.bf16.mxu1 %v1091_v39 }
  0x42   :  { %426 = vadd.xlane.f32.xlu0 %v398_v34  ;;  %1038 = vmatpush3.bf16.msra.mxu1 %v1091_v39  ;;  %v385_v34 = vld [vmem:[#allocation3 + $0x78] sm:$0xff] }
  0x43   :  { %1008 = vmatpush3.bf16.msra.mxu0 %v1076_v26  ;;  %428 = vadd.xlane.f32.xlu1 %v399_v35 }
  0x44   :  { %1039 = vmatprep.subr.bf16.mxu1 %v1092_v40 }
  0x46   :  { %1010 = vmatmul.mubr.bf16.vlgmr.msra.gmra.mxu0 %v99_v8  ;;  %430 = vadd.xlane.f32.xlu0 %v400_v37 }
  0x47   :  { %1013 = vmatprep.mubr.bf16.mxu0 %v101_v14  ;;  %432 = vadd.xlane.f32.xlu1 %v401_v38  ;;  %v380_v14 = vld [vmem:[#allocation3 + $0x50] sm:$0xff] }
  0x48   :  { %1040 = vmatpush3.bf16.msra.mxu1 %v1092_v40 }
  0x4e   :  { %1014 = vmatmul.mubr.bf16.gmra.mxu0 %v103_v19 }
  0x4f   :  { %1017 = vmatprep.mubr.bf16.mxu0 %v105_v24 }
  0x56   :  { %1018 = vmatmul.mubr.bf16.gmra.mxu0 %v107_v29 }
  0x57   :  { %1021 = vmatprep.mubr.bf16.mxu0 %v109_v33 }
  0x5e   :  { %1022 = vmatmul.mubr.bf16.gmra.mxu0 %v111_v36 }
  0xb3   :  { %v403_v44 = vpop.xlane.xlu0 %402 }
  0xb4   :  { %v434_v45 = vadd.f32 %v403_v44, %v370_v42  ;;  %v407_v46 = vpop.xlane.xlu1 %406 }
  0xb5   :  { %v436_v48 = vadd.f32 %v407_v46, %v372_v43 }
  0xb6   :  { %451 = vst.msk [vmem:[#allocation3] sm:$0xff] %vm80_vm0, %v434_v45 }
  0xb7   :  { %v405_v50 = vpop.xlane.xlu0 %404  ;;  %453 = vst.msk [vmem:[#allocation3 + $0x10] sm:$0xff] %vm80_vm0, %v436_v48 }
  0xb8   :  { %v435_v51 = vadd.f32 %v405_v50, %v371_v47  ;;  %v409_v52 = vpop.xlane.xlu1 %408 }
  0xb9   :  { %v437_v53 = vadd.f32 %v409_v52, %v373_v49 }
  0xba   :  { %452 = vst.msk [vmem:[#allocation3 + $0x8] sm:$0xff] %vm80_vm0, %v435_v51 }
  0xbb   :  { %454 = vst.msk [vmem:[#allocation3 + $0x18] sm:$0xff] %vm80_vm0, %v437_v53  ;;  %v411_v56 = vpop.xlane.xlu0 %410 }
  0xbc   :  { %v438_v57 = vadd.f32 %v411_v56, %v374_v54  ;;  %v413_v58 = vpop.xlane.xlu1 %412 }
  0xbd   :  { %v439_v59 = vadd.f32 %v413_v58, %v375_v55  ;;  %v655_v61 = vld [vmem:[#allocation3] sm:$0xff] }
  0xbe   :  { %455 = vst.msk [vmem:[#allocation3 + $0x20] sm:$0xff] %vm80_vm0, %v438_v57  ;;  %v671_v63 = vmax.f32 %v655_v61, 1.0  ;;  %v657_v1 = vld [vmem:[#allocation3 + $0x10] sm:$0xff] }
  0xbf   :  { %456 = vst.msk [vmem:[#allocation3 + $0x28] sm:$0xff] %vm80_vm0, %v439_v59  ;;  %v415_v0 = vpop.xlane.xlu0 %414  ;;  %v673_v8 = vmax.f32 %v657_v1, 1.0 }
  0xc0   :  { %v440_v2 = vadd.f32 %v415_v0, %v376_v60  ;;  %v417_v3 = vpop.xlane.xlu1 %416  ;;  %1101 = vrsqrt.f32 %v671_v63 }
  0xc1   :  { %v441_v4 = vadd.f32 %v417_v3, %v377_v62  ;;  %v656_v5 = vld [vmem:[#allocation3 + $0x8] sm:$0xff] }
  0xc2   :  { %457 = vst.msk [vmem:[#allocation3 + $0x30] sm:$0xff] %vm80_vm0, %v440_v2  ;;  %v672_v7 = vmax.f32 %v656_v5, 1.0  ;;  %v658_v11 = vld [vmem:[#allocation3 + $0x18] sm:$0xff] }
  0xc3   :  { %458 = vst.msk [vmem:[#allocation3 + $0x38] sm:$0xff] %vm80_vm0, %v441_v4  ;;  %v419_v10 = vpop.xlane.xlu0 %418  ;;  %v674_v16 = vmax.f32 %v658_v11, 1.0 }
  0xc4   :  { %1103 = vrsqrt.f32 %v672_v7  ;;  %v442_v12 = vadd.f32 %v419_v10, %v378_v6  ;;  %v421_v13 = vpop.xlane.xlu1 %420 }
  0xc5   :  { %v443_v15 = vadd.f32 %v421_v13, %v379_v9  ;;  %1105 = vrsqrt.f32 %v673_v8  ;;  %v659_v19 = vld [vmem:[#allocation3 + $0x20] sm:$0xff] }
  0xc6   :  { %459 = vst.msk [vmem:[#allocation3 + $0x40] sm:$0xff] %vm80_vm0, %v442_v12  ;;  %1107 = vrsqrt.f32 %v674_v16  ;;  %v675_v24 = vmax.f32 %v659_v19, 1.0  ;;  %v660_v27 = vld [vmem:[#allocation3 + $0x28] sm:$0xff] }
  0xc7   :  { %v423_v18 = vpop.xlane.xlu0 %422  ;;  %460 = vst.msk [vmem:[#allocation3 + $0x48] sm:$0xff] %vm80_vm0, %v443_v15  ;;  %v676_v33 = vmax.f32 %v660_v27, 1.0 }
  0xc8   :  { %v444_v20 = vadd.f32 %v423_v18, %v380_v14  ;;  %v425_v21 = vpop.xlane.xlu1 %424  ;;  %1109 = vrsqrt.f32 %v675_v24 }
  0xc9   :  { %v445_v23 = vadd.f32 %v425_v21, %v381_v17  ;;  %v661_v37 = vld [vmem:[#allocation3 + $0x30] sm:$0xff] }
  0xca   :  { %461 = vst.msk [vmem:[#allocation3 + $0x50] sm:$0xff] %vm80_vm0, %v444_v20  ;;  %v677_v43 = vmax.f32 %v661_v37, 1.0  ;;  %v662_v46 = vld [vmem:[#allocation3 + $0x38] sm:$0xff] }
  0xcb   :  { %v427_v26 = vpop.xlane.xlu0 %426  ;;  %462 = vst.msk [vmem:[#allocation3 + $0x58] sm:$0xff] %vm80_vm0, %v445_v23  ;;  %v678_v48 = vmax.f32 %v662_v46, 1.0 }
  0xcc   :  { %v446_v28 = vadd.f32 %v427_v26, %v382_v22  ;;  %v429_v29 = vpop.xlane.xlu1 %428 }
  0xcd   :  { %v1102_v30 = vpop.eup %1101  ;;  %v447_v32 = vadd.f32 %v429_v29, %v383_v25  ;;  %v663_v51 = vld [vmem:[#allocation3 + $0x40] sm:$0xff] }
  0xce   :  { %463 = vst.msk [vmem:[#allocation3 + $0x60] sm:$0xff] %vm80_vm0, %v446_v28  ;;  %705 = vperm.xlu0 %1067, %v1102_v30   ;;  %v664_v35 = vld [vmem:[#allocation3 + $0x48] sm:$0xff]  ;;  %v679_v53 = vmax.f32 %v663_v51, 1.0 }
  0xcf   :  { %v431_v36 = vpop.xlane.xlu0 %430  ;;  %464 = vst.msk [vmem:[#allocation3 + $0x68] sm:$0xff] %vm80_vm0, %v447_v32  ;;  %v680_v38 = vmax.f32 %v664_v35, 1.0 }
  0xd0   :  { %v448_v39 = vadd.f32 %v431_v36, %v384_v31  ;;  %v433_v40 = vpop.xlane.xlu1 %432 }
  0xd1   :  { %v1104_v41 = vpop.eup %1103  ;;  %v449_v42 = vadd.f32 %v433_v40, %v385_v34  ;;  %1111 = vrsqrt.f32 %v680_v38  ;;  %v665_v56 = vld [vmem:[#allocation3 + $0x50] sm:$0xff] }
  0xd2   :  { %710 = vperm.xlu1 %1068, %v1104_v41   ;;  %465 = vst.msk [vmem:[#allocation3 + $0x70] sm:$0xff] %vm80_vm0, %v448_v39  ;;  %1113 = vrsqrt.f32 %v676_v33  ;;  %v666_v44 = vld [vmem:[#allocation3 + $0x58] sm:$0xff]  ;;  %v1106_v45 = vpop.eup %1105  ;;  %v681_v59 = vmax.f32 %v665_v56, 1.0 }
  0xd3   :  { %466 = vst.msk [vmem:[#allocation3 + $0x78] sm:$0xff] %vm80_vm0, %v449_v42  ;;  %v682_v47 = vmax.f32 %v666_v44, 1.0  ;;  %v1108_v50 = vpop.eup %1107  ;;  %v1330_v42 = vld [vmem:[%s1394_s3] ss:$0 sm:$0xff]  ;;  %s1258_s3 = smov [#allocation10]  }
  0xd4   :  { %s923_s5 = sshll.u32 %s1258_s3, 4  ;;  %s924_s5 = int_to_ptr.vmem [resolvable:$true] %s923_s5 }
  0xd5   :  { %1115 = vrsqrt.f32 %v682_v47  ;;  %v1110_v55 = vpop.eup %1109  ;;  %v667_v61 = vld [vmem:[#allocation3 + $0x60] sm:$0xff]  ;;  %s1225_s6 = scalar_lea.vmem %s924_s5, 2048  ;;  %p1230_p2 = scmp.lt.s32.totalorder %s924_s5, %s924_s5 }
  0xd6   :  { %715 = vperm.xlu1 %1068, %v1106_v45   ;;  %1117 = vrsqrt.f32 %v677_v43  ;;  %v668_v49 = vld [vmem:[#allocation3 + $0x68] sm:$0xff]  ;;  %v683_v63 = vmax.f32 %v667_v61, 1.0  ;;  %p1226_p1 = scmp.ne.s32.totalorder %s924_s5, %s1225_s6  ;;  %p1231_p3 = scmp.lt.s32.totalorder %s1225_s6, %s1225_s6 }
  0xd7   :  { %v684_v52 = vmax.f32 %v668_v49, 1.0 }
  0xd8   :  { %p1232_p4 = por %p1231_p3, %p1230_p2 }
  0xd9   :  { %1119 = vrsqrt.f32 %v684_v52  ;;  %v669_v1 = vld [vmem:[#allocation3 + $0x70] sm:$0xff] }
  0xda   :  { %720 = vperm.xlu1 %1068, %v1108_v50   ;;  %1121 = vrsqrt.f32 %v678_v48  ;;  %v670_v54 = vld [vmem:[#allocation3 + $0x78] sm:$0xff]  ;;  %v685_v3 = vmax.f32 %v669_v1, 1.0  ;;  %p1233_p5 = pnand %p1232_p4, %p1226_p1 }
  0xdb   :  { %v686_v57 = vmax.f32 %v670_v54, 1.0 }
  0xdd   :  { %1123 = vrsqrt.f32 %v686_v57 }
  0xde   :  { %v1112_v58 = vpop.eup %1111  ;;  %725 = vperm.xlu1 %1068, %v1110_v55   ;;  %1125 = vrsqrt.f32 %v679_v53 }
  0xdf   :  { %v1114_v60 = vpop.eup %1113  ;;  %750 = vperm.xlu0 %1067, %v1112_v58   ;;  %1127 = vrsqrt.f32 %v681_v59 }
  0xe0   :  { %1129 = vrsqrt.f32 %v683_v63 }
  0xe1   :  { %1131 = vrsqrt.f32 %v685_v3 }
  0xe2   :  { %v1116_v62 = vpop.eup %1115  ;;  %730 = vperm.xlu1 %1068, %v1114_v60  }
  0xe3   :  { %v1118_v0 = vpop.eup %1117  ;;  %760 = vperm.xlu0 %1067, %v1116_v62  }
  0xe6   :  { %v1120_v2 = vpop.eup %1119  ;;  %735 = vperm.xlu1 %1068, %v1118_v0  }
  0xe7   :  { %v1122_v4 = vpop.eup %1121  ;;  %770 = vperm.xlu0 %1067, %v1120_v2  }
  0xea   :  { %v1124_v5 = vpop.eup %1123  ;;  %740 = vperm.xlu1 %1068, %v1122_v4  }
  0xeb   :  { %v1126_v6 = vpop.eup %1125  ;;  %780 = vperm.xlu0 %1067, %v1124_v5  }
  0xec   :  { %v1128_v7 = vpop.eup %1127 }
  0xed   :  { %v1130_v8 = vpop.eup %1129 }
  0xee   :  { %745 = vperm.xlu1 %1068, %v1126_v6   ;;  %v1132_v9 = vpop.eup %1131 }
  0xf2   :  { %755 = vperm.xlu1 %1068, %v1128_v7  }
  0xf6   :  { %765 = vperm.xlu1 %1068, %v1130_v8  }
  0xfa   :  { %775 = vperm.xlu1 %1068, %v1132_v9  }
 0x106   :  { %v1011_v10 = vpop.f32.mrf.mxu0 }
 0x108   :  { %v275_v11 = vpop.f32.mrf.mxu0 }
 0x10a   :  { %v1012_v12 = vpop.f32.mrf.mxu0 }
 0x10b   :  { %v487_v15 = vpack.c.bf16 %v1012_v12, %v1011_v10 }
 0x10c   :  { %v278_v13 = vpop.f32.mrf.mxu0 }
 0x10d   :  { %v486_v14 = vpack.c.bf16 %v278_v13, %v275_v11 }
 0x10e   :  { %v1015_v16 = vpop.f32.mrf.mxu0 }
 0x10f   :  { %1041 = vmatprep.mubr.bf16.mxu1 %v486_v14 }
 0x110   :  { %v291_v17 = vpop.f32.mrf.mxu0  ;;  %1042 = vmatmul.mubr.bf16.vlgmr.msra.gmra.mxu1 %v487_v15 }
 0x112   :  { %v1016_v18 = vpop.f32.mrf.mxu0 }
 0x113   :  { %v489_v21 = vpack.c.bf16 %v1016_v18, %v1015_v16 }
 0x114   :  { %v294_v19 = vpop.f32.mrf.mxu0 }
 0x115   :  { %v488_v20 = vpack.c.bf16 %v294_v19, %v291_v17 }
 0x116   :  { %v1019_v22 = vpop.f32.mrf.mxu0 }
 0x117   :  { %1045 = vmatprep.mubr.bf16.mxu1 %v488_v20 }
 0x118   :  { %v307_v23 = vpop.f32.mrf.mxu0  ;;  %1046 = vmatmul.mubr.bf16.gmra.mxu1 %v489_v21 }
 0x11a   :  { %v1020_v24 = vpop.f32.mrf.mxu0 }
 0x11b   :  { %v491_v27 = vpack.c.bf16 %v1020_v24, %v1019_v22 }
 0x11c   :  { %v310_v25 = vpop.f32.mrf.mxu0 }
 0x11d   :  { %v490_v26 = vpack.c.bf16 %v310_v25, %v307_v23 }
 0x11e   :  { %v1023_v28 = vpop.f32.mrf.mxu0 }
 0x11f   :  { %1049 = vmatprep.mubr.bf16.mxu1 %v490_v26 }
 0x120   :  { %v323_v29 = vpop.f32.mrf.mxu0  ;;  %1050 = vmatmul.mubr.bf16.gmra.mxu1 %v491_v27 }
 0x122   :  { %v1024_v30 = vpop.f32.mrf.mxu0 }
 0x123   :  { %v493_v33 = vpack.c.bf16 %v1024_v30, %v1023_v28 }
 0x124   :  { %v326_v31 = vpop.f32.mrf.mxu0 }
 0x125   :  { %v492_v32 = vpack.c.bf16 %v326_v31, %v323_v29 }
 0x127   :  { %1053 = vmatprep.mubr.bf16.mxu1 %v492_v32 }
 0x128   :  { %1054 = vmatmul.mubr.bf16.gmra.mxu1 %v493_v33 }
 0x149   :  { %v706_v44 = vpop.permute.xlu0 %705 }
 0x14d   :  { %v711_v34 = vpop.permute.xlu1 %710 }
 0x151   :  { %v716_v35 = vpop.permute.xlu1 %715 }
 0x155   :  { %v721_v36 = vpop.permute.xlu1 %720 }
 0x159   :  { %v726_v37 = vpop.permute.xlu1 %725 }
 0x15a   :  { %v751_v62 = vpop.permute.xlu0 %750 }
 0x15d   :  { %v731_v38 = vpop.permute.xlu1 %730 }
 0x15e   :  { %v761_v12 = vpop.permute.xlu0 %760 }
 0x161   :  { %v736_v39 = vpop.permute.xlu1 %735 }
 0x162   :  { %v771_v33 = vpop.permute.xlu0 %770 }
 0x165   :  { %v741_v40 = vpop.permute.xlu1 %740 }
 0x169   :  { %v746_v52 = vpop.permute.xlu1 %745 }
 0x16d   :  { %v756_v1 = vpop.permute.xlu1 %755 }
 0x171   :  { %v766_v15 = vpop.permute.xlu1 %765 }
 0x1d0   :  { %v1043_v41 = vpop.f32.mrf.mxu1 }
 0x1d1   :  { %v785_v43 = vmul.f32 %v1043_v41, %v716_v35  ;;  %v776_v35 = vpop.permute.xlu1 %775 }
 0x1d2   :  { %v592_v45 = vpop.f32.mrf.mxu1 }
 0x1d3   :  { %v808_v46 = vadd.f32 %v1330_v42, %v785_v43  ;;  %v783_v47 = vmul.f32 %v706_v44, %v592_v45 }
 0x1d4   :  { %v1044_v48 = vpop.f32.mrf.mxu1 }
 0x1d5   :  { %v840_v49 = vmul.f32 0.70710677, %v808_v46  ;;  %v806_v50 = vadd.f32 %v1330_v42, %v783_v47  ;;  %v786_v51 = vmul.f32 %v1044_v48, %v721_v36  ;;  %v824_v23 = vmul.f32 0.5, %v808_v46 }
 0x1d6   :  { %v595_v53 = vpop.f32.mrf.mxu1 }
 0x1d7   :  { %1133 = verf.f32 %v840_v49  ;;  %v838_v54 = vmul.f32 0.70710677, %v806_v50  ;;  %v809_v55 = vadd.f32 %v1330_v42, %v786_v51  ;;  %v784_v56 = vmul.f32 %v711_v34, %v595_v53 }
 0x1d8   :  { %v1047_v57 = vpop.f32.mrf.mxu1  ;;  %v822_v31 = vmul.f32 0.5, %v806_v50 }
 0x1d9   :  { %1135 = verf.f32 %v838_v54  ;;  %v841_v58 = vmul.f32 0.70710677, %v809_v55  ;;  %v789_v59 = vmul.f32 %v1047_v57, %v736_v39  ;;  %v1336_v60 = vadd.f32 %v1330_v42, %v784_v56 }
 0x1da   :  { %v608_v61 = vpop.f32.mrf.mxu1  ;;  %v825_v41 = vmul.f32 0.5, %v809_v55 }
 0x1db   :  { %1137 = verf.f32 %v841_v58  ;;  %v1339_v63 = vadd.f32 %v1330_v42, %v789_v59  ;;  %v787_v0 = vmul.f32 %v726_v37, %v608_v61  ;;  %v839_v2 = vmul.f32 0.70710677, %v1336_v60  ;;  %v781_v59 = vpop.permute.xlu0 %780 }
 0x1dc   :  { %v1048_v3 = vpop.f32.mrf.mxu1  ;;  %v823_v53 = vmul.f32 0.5, %v1336_v60 }
 0x1dd   :  { %v844_v4 = vmul.f32 0.70710677, %v1339_v63  ;;  %v1344_v5 = vadd.f32 %v1330_v42, %v787_v0  ;;  %v790_v6 = vmul.f32 %v1048_v3, %v741_v40  ;;  %1139 = verf.f32 %v839_v2 }
 0x1de   :  { %v611_v7 = vpop.f32.mrf.mxu1  ;;  %v828_v57 = vmul.f32 0.5, %v1339_v63 }
 0x1df   :  { %1141 = verf.f32 %v844_v4  ;;  %v842_v8 = vmul.f32 0.70710677, %v1344_v5  ;;  %v1348_v9 = vadd.f32 %v1330_v42, %v790_v6  ;;  %v788_v10 = vmul.f32 %v731_v38, %v611_v7 }
 0x1e0   :  { %v1051_v11 = vpop.f32.mrf.mxu1  ;;  %v826_v4 = vmul.f32 0.5, %v1344_v5 }
 0x1e1   :  { %1143 = verf.f32 %v842_v8  ;;  %v845_v13 = vmul.f32 0.70710677, %v1348_v9  ;;  %v793_v14 = vmul.f32 %v1051_v11, %v756_v1  ;;  %v1352_v16 = vadd.f32 %v1330_v42, %v788_v10 }
 0x1e2   :  { %v624_v17 = vpop.f32.mrf.mxu1 }
 0x1e3   :  { %1145 = verf.f32 %v845_v13  ;;  %v1355_v18 = vadd.f32 %v1330_v42, %v793_v14  ;;  %v791_v19 = vmul.f32 %v746_v52, %v624_v17  ;;  %v843_v21 = vmul.f32 0.70710677, %v1352_v16 }
 0x1e4   :  { %v1134_v20 = vpop.eup %1133  ;;  %v1052_v22 = vpop.f32.mrf.mxu1 }
 0x1e5   :  { %v872_v24 = vadd.f32 1.0, %v1134_v20  ;;  %v848_v25 = vmul.f32 0.70710677, %v1355_v18  ;;  %v1360_v26 = vadd.f32 %v1330_v42, %v791_v19  ;;  %1147 = verf.f32 %v843_v21 }
 0x1e6   :  { %v1136_v27 = vpop.eup %1135  ;;  %v794_v28 = vmul.f32 %v1052_v22, %v761_v12  ;;  %v627_v29 = vpop.f32.mrf.mxu1  ;;  %v829_v12 = vmul.f32 0.5, %v1348_v9  ;;  %v827_v20 = vmul.f32 0.5, %v1352_v16 }
 0x1e7   :  { %v888_v30 = vmul.f32 %v872_v24, %v824_v23  ;;  %v870_v32 = vadd.f32 1.0, %v1136_v27  ;;  %1149 = verf.f32 %v848_v25  ;;  %v846_v36 = vmul.f32 0.70710677, %v1360_v26 }
 0x1e8   :  { %v1138_v34 = vpop.eup %1137  ;;  %v1364_v37 = vadd.f32 %v1330_v42, %v794_v28  ;;  %v792_v38 = vmul.f32 %v751_v62, %v627_v29  ;;  %v1055_v39 = vpop.f32.mrf.mxu1  ;;  %v832_v23 = vmul.f32 0.5, %v1355_v18 }
 0x1e9   :  { %904 = vst [vmem:[#allocation10 + $0x10] sm:$0xff] %v888_v30  ;;  %v886_v40 = vmul.f32 %v870_v32, %v822_v31  ;;  %v873_v43 = vadd.f32 1.0, %v1138_v34  ;;  %v797_v44 = vmul.f32 %v1055_v39, %v776_v35  ;;  %1151 = verf.f32 %v846_v36 }
 0x1ea   :  { %v849_v45 = vmul.f32 0.70710677, %v1364_v37  ;;  %v1368_v46 = vadd.f32 %v1330_v42, %v792_v38  ;;  %v640_v47 = vpop.f32.mrf.mxu1  ;;  %v1140_v48 = vpop.eup %1139  ;;  %v833_v16 = vmul.f32 0.5, %v1364_v37 }
 0x1eb   :  { %902 = vst [vmem:[#allocation10] sm:$0xff] %v886_v40  ;;  %v889_v49 = vmul.f32 %v873_v43, %v825_v41  ;;  %v1371_v50 = vadd.f32 %v1330_v42, %v797_v44  ;;  %v795_v51 = vmul.f32 %v766_v15, %v640_v47  ;;  %v871_v54 = vadd.f32 1.0, %v1140_v48 }
 0x1ec   :  { %v1142_v52 = vpop.eup %1141  ;;  %1153 = verf.f32 %v849_v45  ;;  %v847_v55 = vmul.f32 0.70710677, %v1368_v46  ;;  %v1056_v56 = vpop.f32.mrf.mxu1  ;;  %v831_v18 = vmul.f32 0.5, %v1368_v46 }
 0x1ed   :  { %905 = vst [vmem:[#allocation10 + $0x18] sm:$0xff] %v889_v49  ;;  %v876_v58 = vadd.f32 1.0, %v1142_v52  ;;  %v852_v61 = vmul.f32 0.70710677, %v1371_v50  ;;  %v818_v62 = vadd.f32 %v1330_v42, %v795_v51  ;;  %v887_v1 = vmul.f32 %v871_v54, %v823_v53 }
 0x1ee   :  { %v1144_v0 = vpop.eup %1143  ;;  %1155 = verf.f32 %v847_v55  ;;  %v798_v2 = vmul.f32 %v1056_v56, %v781_v59  ;;  %v643_v3 = vpop.f32.mrf.mxu1  ;;  %v836_v36 = vmul.f32 0.5, %v1371_v50 }
 0x1ef   :  { %v892_v60 = vmul.f32 %v876_v58, %v828_v57  ;;  %v874_v6 = vadd.f32 1.0, %v1144_v0  ;;  %1157 = verf.f32 %v852_v61  ;;  %903 = vst [vmem:[#allocation10 + $0x8] sm:$0xff] %v887_v1  ;;  %v850_v8 = vmul.f32 0.70710677, %v818_v62 }
 0x1f0   :  { %v1146_v7 = vpop.eup %1145  ;;  %v821_v63 = vadd.f32 %v1330_v42, %v798_v2  ;;  %v796_v10 = vmul.f32 %v771_v33, %v643_v3  ;;  %v834_v41 = vmul.f32 0.5, %v818_v62 }
 0x1f1   :  { %908 = vst [vmem:[#allocation10 + $0x30] sm:$0xff] %v892_v60  ;;  %v890_v11 = vmul.f32 %v874_v6, %v826_v4  ;;  %v877_v13 = vadd.f32 1.0, %v1146_v7  ;;  %1159 = verf.f32 %v850_v8 }
 0x1f2   :  { %v853_v14 = vmul.f32 0.70710677, %v821_v63  ;;  %v819_v15 = vadd.f32 %v1330_v42, %v796_v10  ;;  %v1148_v17 = vpop.eup %1147  ;;  %v830_v42 = vmul.f32 0.5, %v1360_v26  ;;  %v837_v45 = vmul.f32 0.5, %v821_v63 }
 0x1f3   :  { %906 = vst [vmem:[#allocation10 + $0x20] sm:$0xff] %v890_v11  ;;  %v893_v5 = vmul.f32 %v877_v13, %v829_v12  ;;  %v875_v21 = vadd.f32 1.0, %v1148_v17 }
 0x1f4   :  { %v1150_v19 = vpop.eup %1149  ;;  %1161 = verf.f32 %v853_v14  ;;  %v851_v22 = vmul.f32 0.70710677, %v819_v15  ;;  %v835_v49 = vmul.f32 0.5, %v819_v15 }
 0x1f5   :  { %909 = vst [vmem:[#allocation10 + $0x38] sm:$0xff] %v893_v5  ;;  %v880_v24 = vadd.f32 1.0, %v1150_v19  ;;  %v891_v25 = vmul.f32 %v875_v21, %v827_v20 }
 0x1f6   :  { %1163 = verf.f32 %v851_v22  ;;  %v1152_v9 = vpop.eup %1151 }
 0x1f7   :  { %v896_v27 = vmul.f32 %v880_v24, %v832_v23  ;;  %907 = vst [vmem:[#allocation10 + $0x28] sm:$0xff] %v891_v25  ;;  %v878_v28 = vadd.f32 1.0, %v1152_v9 }
 0x1f9   :  { %v1154_v29 = vpop.eup %1153  ;;  %912 = vst [vmem:[#allocation10 + $0x50] sm:$0xff] %v896_v27  ;;  %v894_v30 = vmul.f32 %v878_v28, %v830_v42 }
 0x1fa   :  { %v881_v31 = vadd.f32 1.0, %v1154_v29 }
 0x1fb   :  { %v1156_v32 = vpop.eup %1155  ;;  %910 = vst [vmem:[#allocation10 + $0x40] sm:$0xff] %v894_v30 }
 0x1fc   :  { %v1158_v33 = vpop.eup %1157  ;;  %v897_v34 = vmul.f32 %v881_v31, %v833_v16  ;;  %v879_v35 = vadd.f32 1.0, %v1156_v32 }
 0x1fd   :  { %v884_v38 = vadd.f32 1.0, %v1158_v33 }
 0x1fe   :  { %913 = vst [vmem:[#allocation10 + $0x58] sm:$0xff] %v897_v34  ;;  %v895_v39 = vmul.f32 %v879_v35, %v831_v18  ;;  %v1160_v26 = vpop.eup %1159 }
 0x1ff   :  { %v900_v40 = vmul.f32 %v884_v38, %v836_v36  ;;  %v882_v43 = vadd.f32 1.0, %v1160_v26 }
 0x200   :  { %911 = vst [vmem:[#allocation10 + $0x48] sm:$0xff] %v895_v39 }
 0x201   :  { %v1162_v44 = vpop.eup %1161  ;;  %916 = vst [vmem:[#allocation10 + $0x70] sm:$0xff] %v900_v40  ;;  %v898_v37 = vmul.f32 %v882_v43, %v834_v41 }
 0x202   :  { %v885_v47 = vadd.f32 1.0, %v1162_v44 }
 0x203   :  { %v1164_v48 = vpop.eup %1163  ;;  %914 = vst [vmem:[#allocation10 + $0x60] sm:$0xff] %v898_v37 }
 0x204   :  { %v901_v46 = vmul.f32 %v885_v47, %v837_v45  ;;  %v883_v50 = vadd.f32 1.0, %v1164_v48 }
 0x206   :  { %917 = vst [vmem:[#allocation10 + $0x78] sm:$0xff] %v901_v46  ;;  %v899_v51 = vmul.f32 %v883_v50, %v835_v49 }
 0x208   :  { %915 = vst [vmem:[#allocation10 + $0x68] sm:$0xff] %v899_v51 }
 0x209   :  { %1236 = shalt.err (!%p1233_p5)
}
 0x20a   :  { %s1259_s7 = smov 128   ;;  %s1260_s8 = smov 8  }
 0x20b   :  { %929 = dma.vmem_to_hbm [thread:$0]  %s924_s5, 2048, %s1395_s4, [#allocation6], %s1259_s7, %s1259_s7, %s1260_s8  }
 0x20c   :  { %1249 = dma.done.wait [#allocation6], 2048  }
 0x20d   :  { %1250 = vsyncadd [#allocation6], 4294965248 }
 0x20e   :  { %933 = vsyncpa [#allocation5], 1 }
 0x20f   :  { %934 = vsyncpa [#allocation8], 1 }
 0x210   :  { %935 = vsyncpa [#allocation6], 1 }

</bundles_post_ra>
